<compile_context>
chip_gen: v7x
topology: tpu7x:2x2x1
jax: 0.10.0
libtpu: 0.0.40
codegen_flags: <defaults>
</compile_context>

<pallas_src>
import jax
import jax.numpy as jnp
import numpy as np
from jax.experimental import pallas as pl
from jax.experimental.pallas import tpu as pltpu


def gleason_kernel(x_ref, wc1_ref, b1d_ref, wc2_ref, b2p_ref, wc3_ref, b3p_ref,
                   wf1_ref, bf1_ref, wf2_ref, bf2_ref, out_ref):
    x = x_ref[...]                                        # (TB, F)

    # ---- conv1, taps fused on N:  (TB,F) @ (F,512) -----------------------
    # cols 0:256  -> conv1 out pos 1  (x @ W1_tap1)
    # cols 256:512-> conv1 out pos 2  (x @ W1_tap0)
    h1 = jnp.maximum(
        jnp.dot(x, wc1_ref[...], preferred_element_type=jnp.float32)
        + b1d_ref[...], 0.0)                              # (TB, 512)

    # ---- conv2, taps fused on N: two (TB,256)@(256,256) sharing one RHS --
    # wc2 cols 0:128 = W2_tap0, cols 128:256 = W2_tap1
    wc2 = wc2_ref[...]
    y2a = jnp.dot(h1[:, :256], wc2, preferred_element_type=jnp.float32)  # h1 pos1
    y2b = jnp.dot(h1[:, 256:], wc2, preferred_element_type=jnp.float32)  # h1 pos2
    b2 = b2p_ref[0:1, :]                                  # (1,128)
    bias2_2 = b2p_ref[1:2, :]                             # c1@W2_0 + b2
    bias2_4 = b2p_ref[2:3, :]                             # c1@W2_1 + b2
    h2_2 = jnp.maximum(y2a[:, 128:] + bias2_2, 0.0)       # conv2 out pos 2
    h2_3 = jnp.maximum(y2a[:, :128] + y2b[:, 128:] + b2, 0.0)   # pos 3
    h2_4 = jnp.maximum(y2b[:, :128] + bias2_4, 0.0)       # pos 4

    # ---- conv3, taps fused on N: three (TB,128)@(128,128) sharing one RHS
    # wc3 cols 0:64 = W3_tap0, cols 64:128 = W3_tap1
    wc3 = wc3_ref[...]
    y3a = jnp.dot(h2_2, wc3, preferred_element_type=jnp.float32)
    y3b = jnp.dot(h2_3, wc3, preferred_element_type=jnp.float32)
    y3c = jnp.dot(h2_4, wc3, preferred_element_type=jnp.float32)
    b3 = b3p_ref[0:1, :]                                  # (1,64)
    bias3_3 = b3p_ref[1:2, :]                             # c2_1@W3_0 + b3
    bias3_6 = b3p_ref[2:3, :]                             # c2_5@W3_1 + b3
    c3_2 = b3p_ref[3:4, :]                                # const conv3 out pos 2
    c3_7 = b3p_ref[4:5, :]                                # const conv3 out pos 7
    h3_3 = jnp.maximum(y3a[:, 64:] + bias3_3, 0.0)        # conv3 out pos 3
    h3_4 = jnp.maximum(y3a[:, :64] + y3b[:, 64:] + b3, 0.0)     # pos 4
    h3_5 = jnp.maximum(y3b[:, :64] + y3c[:, 64:] + b3, 0.0)     # pos 5
    h3_6 = jnp.maximum(y3c[:, :64] + bias3_6, 0.0)        # pos 6

    # ---- MaxPool1d(2,2): only the batch-dependent pooled positions 1..3 --
    p1 = jnp.maximum(h3_3, c3_2)                          # max(pos2, pos3)
    p2 = jnp.maximum(h3_4, h3_5)                          # max(pos4, pos5)
    p3 = jnp.maximum(h3_6, c3_7)                          # max(pos6, pos7)
    # pooled positions 0 and 4 are batch-constant; folded into bf1 (wrapper).

    # TODO(synk): F.dropout(p=0.5) (training=True in the reference) is
    # stochastic; implemented as identity (inference semantics).

    # ---- fc1 over the channel-major flatten (constant terms pre-folded) --
    z = jnp.dot(p1, wf1_ref[0], preferred_element_type=jnp.float32)
    z = z + jnp.dot(p2, wf1_ref[1], preferred_element_type=jnp.float32)
    z = z + jnp.dot(p3, wf1_ref[2], preferred_element_type=jnp.float32)
    z = jnp.maximum(z + bf1_ref[...], 0.0)                # (TB, 64)

    # ---- fc2, lane-padded to 128 output columns for a dense store --------
    out = jnp.dot(z, wf2_ref[...], preferred_element_type=jnp.float32) + bf2_ref[...]
    out_ref[...] = out.astype(out_ref.dtype)


def gleason_forward(x, params, *, num_class, tile_b=None):
    B, F = x.shape
    W1, b1, W2, b2, W3, b3, Wfc1, bfc1, Wfc2, bfc2 = params
    f32 = jnp.float32

    # ---- plain-JAX glue: weight prep + batch-constant folding ---------------
    w1_0 = W1[:, :, 0].T.astype(f32)                      # (F, 256)  tap applied to h[t-2]
    w1_1 = W1[:, :, 1].T.astype(f32)                      # (F, 256)  tap applied to h[t-1]
    w2_0 = W2[:, :, 0].T.astype(f32)                      # (256, 128)
    w2_1 = W2[:, :, 1].T.astype(f32)
    w3_0 = W3[:, :, 0].T.astype(f32)                      # (128, 64)
    w3_1 = W3[:, :, 1].T.astype(f32)
    b1f, b2f, b3f = b1.astype(f32), b2.astype(f32), b3.astype(f32)

    # conv1 fused: cols 0:256 -> out pos1 (tap1), cols 256:512 -> out pos2 (tap0)
    wc1 = jnp.concatenate([w1_1, w1_0], axis=1)           # (F, 512)
    b1d = jnp.concatenate([b1f, b1f])[None, :]            # (1, 512)

    # conv1 constant row (out pos 0 and 3): relu(b1)
    c1 = jax.nn.relu(b1f)[None, :]                        # (1, 256)

    # conv2 fused taps + folded bias rows
    wc2 = jnp.concatenate([w2_0, w2_1], axis=1)           # (256, 256)
    bias2_2 = c1 @ w2_0 + b2f[None, :]                    # feeds conv2 out pos 2
    bias2_4 = c1 @ w2_1 + b2f[None, :]                    # feeds conv2 out pos 4
    b2pack = jnp.concatenate([b2f[None, :], bias2_2, bias2_4], axis=0)   # (3, 128)

    # conv2 constant rows (out pos 0,1,5,6)
    c2_0 = jax.nn.relu(b2f)[None, :]                      # pos 0 and 6
    c2_1 = jax.nn.relu(bias2_4)                           # pos 1
    c2_5 = jax.nn.relu(bias2_2)                           # pos 5

    # conv3 fused taps + folded bias rows
    wc3 = jnp.concatenate([w3_0, w3_1], axis=1)           # (128, 128)
    bias3_3 = c2_1 @ w3_0 + b3f[None, :]                  # feeds conv3 out pos 3
    bias3_6 = c2_5 @ w3_1 + b3f[None, :]                  # feeds conv3 out pos 6
    # conv3 constant rows (out pos 0,1,2,7,8,9)
    c3_0 = jax.nn.relu(b3f)[None, :]                      # pos 0 and 9
    c3_1 = jax.nn.relu(c2_0 @ w3_1 + b3f[None, :])
    c3_2 = jax.nn.relu(c2_0 @ w3_0 + c2_1 @ w3_1 + b3f[None, :])
    c3_7 = jax.nn.relu(c2_5 @ w3_0 + c2_0 @ w3_1 + b3f[None, :])
    c3_8 = jax.nn.relu(c2_0 @ w3_0 + b3f[None, :])
    b3pack = jnp.concatenate([b3f[None, :], bias3_3, bias3_6, c3_2, c3_7], axis=0)  # (5, 64)

    # pooled constants (positions 0 and 4 of the max-pooled sequence)
    pooled0_c = jnp.maximum(c3_0, c3_1)                   # (1, 64)
    pooled4_c = jnp.maximum(c3_8, c3_0)                   # (1, 64)

    # fc1: PyTorch flatten index is c*5 + l; regroup columns to (l, cin, out).
    wf1t = jnp.transpose(Wfc1.astype(f32).reshape(64, 64, 5), (2, 1, 0))  # (5, 64, 64)
    bf1_eff = (bfc1.astype(f32)[None, :]
               + pooled0_c @ wf1t[0] + pooled4_c @ wf1t[4])               # (1, 64)
    wf1d = wf1t[1:4]                                      # (3, 64, 64) for pooled 1..3

    # fc2: transpose and zero-pad output columns to a full 128-lane slab.
    nc_pad = max(128, ((num_class + 127) // 128) * 128)
    wf2t = jnp.pad(Wfc2.astype(f32).T, ((0, 0), (0, nc_pad - num_class)))  # (64, nc_pad)
    bf2r = jnp.pad(bfc2.astype(f32).reshape(1, -1), ((0, 0), (0, nc_pad - num_class)))

    # ---- batch tiling: large tiles, pad ragged batches with zero rows -------
    if tile_b is None:
        tile_b = min(((B + 7) // 8) * 8, 512)
    tile_b = max(8, ((tile_b + 7) // 8) * 8)
    B_pad = ((B + tile_b - 1) // tile_b) * tile_b
    x_p = jnp.pad(x, ((0, B_pad - B), (0, 0))) if B_pad != B else x
    grid = (B_pad // tile_b,)

    def full(shape):
        return pl.BlockSpec(shape, lambda i, _n=len(shape): (0,) * _n)

    # Advisory cost estimate for XLA scheduling (post constant-elimination).
    flops_per_row = 2 * (F * 512 + 2 * 256 * 256 + 3 * 128 * 128
                         + 3 * 64 * 64 + 64 * nc_pad)
    weights = (wc1, b1d, wc2, b2pack, wc3, b3pack, wf1d, bf1_eff, wf2t, bf2r)
    weight_bytes = sum(int(np.prod(a.shape)) * 4 for a in weights)
    cost = pl.CostEstimate(
        flops=int(B_pad * flops_per_row),
        transcendentals=0,
        bytes_accessed=int(B_pad * F * 4 + weight_bytes + B_pad * nc_pad * 4))

    out = pl.pallas_call(
        gleason_kernel,
        out_shape=jax.ShapeDtypeStruct((B_pad, nc_pad), x.dtype),
        grid_spec=pltpu.PrefetchScalarGridSpec(
            num_scalar_prefetch=0,
            grid=grid,
            in_specs=[
                pl.BlockSpec((tile_b, F), lambda i: (i, 0)),
                full(wc1.shape), full(b1d.shape),
                full(wc2.shape), full(b2pack.shape),
                full(wc3.shape), full(b3pack.shape),
                full(wf1d.shape), full(bf1_eff.shape),
                full(wf2t.shape), full(bf2r.shape),
            ],
            out_specs=pl.BlockSpec((tile_b, nc_pad), lambda i: (i, 0)),
        ),
        compiler_params=pltpu.CompilerParams(
            dimension_semantics=("parallel",),
            vmem_limit_bytes=48 * 1024 * 1024),
        cost_estimate=cost,
    )(x_p, wc1, b1d, wc2, b2pack, wc3, b3pack, wf1d, bf1_eff, wf2t, bf2r)

    return out[:B, :num_class]


def ref_forward(x, params):
    """Pure-JAX reference mirroring the PyTorch module (inference, no dropout)."""
    W1, b1, W2, b2, W3, b3, Wfc1, bfc1, Wfc2, bfc2 = params
    h = x[:, :, None]                                     # (B, F, 1)  NCW

    def conv_relu(h, W, b):
        y = jax.lax.conv_general_dilated(
            h, W, window_strides=(1,), padding=[(2, 2)],
            dimension_numbers=("NCH", "OIH", "NCH"))
        return jax.nn.relu(y + b[None, :, None])

    h = conv_relu(h, W1, b1)
    h = conv_relu(h, W2, b2)
    h = conv_relu(h, W3, b3)
    B, C, L = h.shape
    h = h[:, :, :(L // 2) * 2].reshape(B, C, L // 2, 2).max(axis=-1)
    flat = h.reshape(B, -1)
    z = jax.nn.relu(flat @ Wfc1.T + bfc1)
    return z @ Wfc2.T + bfc2


if __name__ == "__main__":
    B, F, NC = 16, 32, 4                                  # input_features=32, num_class=4
    key = jax.random.PRNGKey(0)
    ks = jax.random.split(key, 11)
    s = 0.1
    x = jax.random.normal(ks[0], (B, F), jnp.float32)
    W1 = s * jax.random.normal(ks[1], (256, F, 2), jnp.float32)
    b1 = s * jax.random.normal(ks[2], (256,), jnp.float32)
    W2 = s * jax.random.normal(ks[3], (128, 256, 2), jnp.float32)
    b2 = s * jax.random.normal(ks[4], (128,), jnp.float32)
    W3 = s * jax.random.normal(ks[5], (64, 128, 2), jnp.float32)
    b3 = s * jax.random.normal(ks[6], (64,), jnp.float32)
    Wfc1 = s * jax.random.normal(ks[7], (64, 320), jnp.float32)
    bfc1 = s * jax.random.normal(ks[8], (64,), jnp.float32)
    Wfc2 = s * jax.random.normal(ks[9], (NC, 64), jnp.float32)
    bfc2 = s * jax.random.normal(ks[10], (NC,), jnp.float32)
    params = (W1, b1, W2, b2, W3, b3, Wfc1, bfc1, Wfc2, bfc2)

    out = gleason_forward(x, params, num_class=NC)        # B=16 -> single grid step
    out = jax.block_until_ready(out)

    ref = ref_forward(x, params)
    assert out.shape == (B, NC)
    np.testing.assert_allclose(np.asarray(out), np.asarray(ref), rtol=1e-4, atol=1e-4)
    print("KERNEL_OK")
</pallas_src>

<mosaic_0001>
module attributes {stable_mosaic.version = 11 : i64} {
  func.func @gleason_kernel(%arg0: i32, %arg1: memref<16x32xf32, #tpu.memory_space<vmem>>, %arg2: memref<32x512xf32, #tpu.memory_space<vmem>>, %arg3: memref<1x512xf32, #tpu.memory_space<vmem>>, %arg4: memref<256x256xf32, #tpu.memory_space<vmem>>, %arg5: memref<3x128xf32, #tpu.memory_space<vmem>>, %arg6: memref<128x128xf32, #tpu.memory_space<vmem>>, %arg7: memref<5x64xf32, #tpu.memory_space<vmem>>, %arg8: memref<3x64x64xf32, #tpu.memory_space<vmem>>, %arg9: memref<1x64xf32, #tpu.memory_space<vmem>>, %arg10: memref<64x128xf32, #tpu.memory_space<vmem>>, %arg11: memref<1x128xf32, #tpu.memory_space<vmem>>, %arg12: memref<16x128xf32, #tpu.memory_space<vmem>>) attributes {dimension_semantics = [#tpu.dimension_semantics<parallel>], iteration_bounds = array<i64: 1>, scalar_prefetch = 0 : i64, scratch_operands = 0 : i64, tpu.core_type = #tpu.core_type<tc>, window_params = [{transform_indices = @transform_0, window_bounds = array<i64: 16, 32>}, {pipeline_mode = #tpu.pipeline_mode<synchronous>, transform_indices = @transform_1, window_bounds = array<i64: 32, 512>}, {pipeline_mode = #tpu.pipeline_mode<synchronous>, transform_indices = @transform_2, window_bounds = array<i64: 1, 512>}, {pipeline_mode = #tpu.pipeline_mode<synchronous>, transform_indices = @transform_3, window_bounds = array<i64: 256, 256>}, {pipeline_mode = #tpu.pipeline_mode<synchronous>, transform_indices = @transform_4, window_bounds = array<i64: 3, 128>}, {pipeline_mode = #tpu.pipeline_mode<synchronous>, transform_indices = @transform_5, window_bounds = array<i64: 128, 128>}, {pipeline_mode = #tpu.pipeline_mode<synchronous>, transform_indices = @transform_6, window_bounds = array<i64: 5, 64>}, {pipeline_mode = #tpu.pipeline_mode<synchronous>, transform_indices = @transform_7, window_bounds = array<i64: 3, 64, 64>}, {pipeline_mode = #tpu.pipeline_mode<synchronous>, transform_indices = @transform_8, window_bounds = array<i64: 1, 64>}, {pipeline_mode = #tpu.pipeline_mode<synchronous>, transform_indices = @transform_9, window_bounds = array<i64: 64, 128>}, {pipeline_mode = #tpu.pipeline_mode<synchronous>, transform_indices = @transform_10, window_bounds = array<i64: 1, 128>}, {transform_indices = @transform_11, window_bounds = array<i64: 16, 128>}]} {
    %c0 = arith.constant 0 : index
    %c0_0 = arith.constant 0 : index
    %0 = vector.load %arg1[%c0, %c0_0] : memref<16x32xf32, #tpu.memory_space<vmem>>, vector<16x32xf32>
    %c0_1 = arith.constant 0 : index
    %c0_2 = arith.constant 0 : index
    %1 = vector.load %arg2[%c0_1, %c0_2] : memref<32x512xf32, #tpu.memory_space<vmem>>, vector<32x512xf32>
    %cst = arith.constant dense<0.000000e+00> : vector<16x512xf32>
    %2 = tpu.matmul %0, %1, %cst {dimension_numbers = #tpu.dot_dimension_numbers<[1], [0], [0], [1], [0, 0, 1, 1], [], []>} : vector<16x32xf32>, vector<32x512xf32>, vector<16x512xf32> -> vector<16x512xf32>
    %c0_3 = arith.constant 0 : index
    %c0_4 = arith.constant 0 : index
    %3 = vector.load %arg3[%c0_3, %c0_4] : memref<1x512xf32, #tpu.memory_space<vmem>>, vector<1x512xf32>
    %4 = vector.broadcast %3 : vector<1x512xf32> to vector<16x512xf32>
    %5 = arith.addf %2, %4 : vector<16x512xf32>
    %cst_5 = arith.constant 0.000000e+00 : f32
    %6 = vector.broadcast %cst_5 : f32 to vector<16x512xf32>
    %7 = arith.maximumf %5, %6 : vector<16x512xf32>
    %c0_6 = arith.constant 0 : index
    %c0_7 = arith.constant 0 : index
    %8 = vector.load %arg4[%c0_6, %c0_7] : memref<256x256xf32, #tpu.memory_space<vmem>>, vector<256x256xf32>
    %9 = vector.extract_strided_slice %7 {offsets = [0, 0], sizes = [16, 256], strides = [1, 1]} : vector<16x512xf32> to vector<16x256xf32>
    %cst_8 = arith.constant dense<0.000000e+00> : vector<16x256xf32>
    %10 = tpu.matmul %9, %8, %cst_8 {dimension_numbers = #tpu.dot_dimension_numbers<[1], [0], [0], [1], [0, 0, 1, 1], [], []>} : vector<16x256xf32>, vector<256x256xf32>, vector<16x256xf32> -> vector<16x256xf32>
    %11 = vector.extract_strided_slice %7 {offsets = [0, 256], sizes = [16, 256], strides = [1, 1]} : vector<16x512xf32> to vector<16x256xf32>
    %cst_9 = arith.constant dense<0.000000e+00> : vector<16x256xf32>
    %12 = tpu.matmul %11, %8, %cst_9 {dimension_numbers = #tpu.dot_dimension_numbers<[1], [0], [0], [1], [0, 0, 1, 1], [], []>} : vector<16x256xf32>, vector<256x256xf32>, vector<16x256xf32> -> vector<16x256xf32>
    %c0_10 = arith.constant 0 : index
    %c0_11 = arith.constant 0 : index
    %13 = vector.load %arg5[%c0_10, %c0_11] : memref<3x128xf32, #tpu.memory_space<vmem>>, vector<1x128xf32>
    %c1 = arith.constant 1 : index
    %c0_12 = arith.constant 0 : index
    %14 = vector.load %arg5[%c1, %c0_12] : memref<3x128xf32, #tpu.memory_space<vmem>>, vector<1x128xf32>
    %c2 = arith.constant 2 : index
    %c0_13 = arith.constant 0 : index
    %15 = vector.load %arg5[%c2, %c0_13] : memref<3x128xf32, #tpu.memory_space<vmem>>, vector<1x128xf32>
    %16 = vector.extract_strided_slice %10 {offsets = [0, 128], sizes = [16, 128], strides = [1, 1]} : vector<16x256xf32> to vector<16x128xf32>
    %17 = vector.broadcast %14 : vector<1x128xf32> to vector<16x128xf32>
    %18 = arith.addf %16, %17 : vector<16x128xf32>
    %cst_14 = arith.constant 0.000000e+00 : f32
    %19 = vector.broadcast %cst_14 : f32 to vector<16x128xf32>
    %20 = arith.maximumf %18, %19 : vector<16x128xf32>
    %21 = vector.extract_strided_slice %10 {offsets = [0, 0], sizes = [16, 128], strides = [1, 1]} : vector<16x256xf32> to vector<16x128xf32>
    %22 = vector.extract_strided_slice %12 {offsets = [0, 128], sizes = [16, 128], strides = [1, 1]} : vector<16x256xf32> to vector<16x128xf32>
    %23 = arith.addf %21, %22 : vector<16x128xf32>
    %24 = vector.broadcast %13 : vector<1x128xf32> to vector<16x128xf32>
    %25 = arith.addf %23, %24 : vector<16x128xf32>
    %cst_15 = arith.constant 0.000000e+00 : f32
    %26 = vector.broadcast %cst_15 : f32 to vector<16x128xf32>
    %27 = arith.maximumf %25, %26 : vector<16x128xf32>
    %28 = vector.extract_strided_slice %12 {offsets = [0, 0], sizes = [16, 128], strides = [1, 1]} : vector<16x256xf32> to vector<16x128xf32>
    %29 = vector.broadcast %15 : vector<1x128xf32> to vector<16x128xf32>
    %30 = arith.addf %28, %29 : vector<16x128xf32>
    %cst_16 = arith.constant 0.000000e+00 : f32
    %31 = vector.broadcast %cst_16 : f32 to vector<16x128xf32>
    %32 = arith.maximumf %30, %31 : vector<16x128xf32>
    %c0_17 = arith.constant 0 : index
    %c0_18 = arith.constant 0 : index
    %33 = vector.load %arg6[%c0_17, %c0_18] : memref<128x128xf32, #tpu.memory_space<vmem>>, vector<128x128xf32>
    %cst_19 = arith.constant dense<0.000000e+00> : vector<16x128xf32>
    %34 = tpu.matmul %20, %33, %cst_19 {dimension_numbers = #tpu.dot_dimension_numbers<[1], [0], [0], [1], [0, 0, 1, 1], [], []>} : vector<16x128xf32>, vector<128x128xf32>, vector<16x128xf32> -> vector<16x128xf32>
    %cst_20 = arith.constant dense<0.000000e+00> : vector<16x128xf32>
    %35 = tpu.matmul %27, %33, %cst_20 {dimension_numbers = #tpu.dot_dimension_numbers<[1], [0], [0], [1], [0, 0, 1, 1], [], []>} : vector<16x128xf32>, vector<128x128xf32>, vector<16x128xf32> -> vector<16x128xf32>
    %cst_21 = arith.constant dense<0.000000e+00> : vector<16x128xf32>
    %36 = tpu.matmul %32, %33, %cst_21 {dimension_numbers = #tpu.dot_dimension_numbers<[1], [0], [0], [1], [0, 0, 1, 1], [], []>} : vector<16x128xf32>, vector<128x128xf32>, vector<16x128xf32> -> vector<16x128xf32>
    %c0_22 = arith.constant 0 : index
    %c0_23 = arith.constant 0 : index
    %37 = vector.load %arg7[%c0_22, %c0_23] : memref<5x64xf32, #tpu.memory_space<vmem>>, vector<1x64xf32>
    %c1_24 = arith.constant 1 : index
    %c0_25 = arith.constant 0 : index
    %38 = vector.load %arg7[%c1_24, %c0_25] : memref<5x64xf32, #tpu.memory_space<vmem>>, vector<1x64xf32>
    %c2_26 = arith.constant 2 : index
    %c0_27 = arith.constant 0 : index
    %39 = vector.load %arg7[%c2_26, %c0_27] : memref<5x64xf32, #tpu.memory_space<vmem>>, vector<1x64xf32>
    %c3 = arith.constant 3 : index
    %c0_28 = arith.constant 0 : index
    %40 = vector.load %arg7[%c3, %c0_28] : memref<5x64xf32, #tpu.memory_space<vmem>>, vector<1x64xf32>
    %c4 = arith.constant 4 : index
    %c0_29 = arith.constant 0 : index
    %41 = vector.load %arg7[%c4, %c0_29] : memref<5x64xf32, #tpu.memory_space<vmem>>, vector<1x64xf32>
    %42 = vector.extract_strided_slice %34 {offsets = [0, 64], sizes = [16, 64], strides = [1, 1]} : vector<16x128xf32> to vector<16x64xf32>
    %43 = vector.broadcast %38 : vector<1x64xf32> to vector<16x64xf32>
    %44 = arith.addf %42, %43 : vector<16x64xf32>
    %cst_30 = arith.constant 0.000000e+00 : f32
    %45 = vector.broadcast %cst_30 : f32 to vector<16x64xf32>
    %46 = arith.maximumf %44, %45 : vector<16x64xf32>
    %47 = vector.extract_strided_slice %34 {offsets = [0, 0], sizes = [16, 64], strides = [1, 1]} : vector<16x128xf32> to vector<16x64xf32>
    %48 = vector.extract_strided_slice %35 {offsets = [0, 64], sizes = [16, 64], strides = [1, 1]} : vector<16x128xf32> to vector<16x64xf32>
    %49 = arith.addf %47, %48 : vector<16x64xf32>
    %50 = vector.broadcast %37 : vector<1x64xf32> to vector<16x64xf32>
    %51 = arith.addf %49, %50 : vector<16x64xf32>
    %cst_31 = arith.constant 0.000000e+00 : f32
    %52 = vector.broadcast %cst_31 : f32 to vector<16x64xf32>
    %53 = arith.maximumf %51, %52 : vector<16x64xf32>
    %54 = vector.extract_strided_slice %35 {offsets = [0, 0], sizes = [16, 64], strides = [1, 1]} : vector<16x128xf32> to vector<16x64xf32>
    %55 = vector.extract_strided_slice %36 {offsets = [0, 64], sizes = [16, 64], strides = [1, 1]} : vector<16x128xf32> to vector<16x64xf32>
    %56 = arith.addf %54, %55 : vector<16x64xf32>
    %57 = vector.broadcast %37 : vector<1x64xf32> to vector<16x64xf32>
    %58 = arith.addf %56, %57 : vector<16x64xf32>
    %cst_32 = arith.constant 0.000000e+00 : f32
    %59 = vector.broadcast %cst_32 : f32 to vector<16x64xf32>
    %60 = arith.maximumf %58, %59 : vector<16x64xf32>
    %61 = vector.extract_strided_slice %36 {offsets = [0, 0], sizes = [16, 64], strides = [1, 1]} : vector<16x128xf32> to vector<16x64xf32>
    %62 = vector.broadcast %39 : vector<1x64xf32> to vector<16x64xf32>
    %63 = arith.addf %61, %62 : vector<16x64xf32>
    %cst_33 = arith.constant 0.000000e+00 : f32
    %64 = vector.broadcast %cst_33 : f32 to vector<16x64xf32>
    %65 = arith.maximumf %63, %64 : vector<16x64xf32>
    %66 = vector.broadcast %40 : vector<1x64xf32> to vector<16x64xf32>
    %67 = arith.maximumf %46, %66 : vector<16x64xf32>
    %68 = arith.maximumf %53, %60 : vector<16x64xf32>
    %69 = vector.broadcast %41 : vector<1x64xf32> to vector<16x64xf32>
    %70 = arith.maximumf %65, %69 : vector<16x64xf32>
    %c0_34 = arith.constant 0 : index
    %c0_35 = arith.constant 0 : index
    %c0_36 = arith.constant 0 : index
    %71 = vector.load %arg8[%c0_34, %c0_35, %c0_36] : memref<3x64x64xf32, #tpu.memory_space<vmem>>, vector<1x64x64xf32>
    %72 = vector.shape_cast %71 : vector<1x64x64xf32> to vector<64x64xf32>
    %cst_37 = arith.constant dense<0.000000e+00> : vector<16x64xf32>
    %73 = tpu.matmul %67, %72, %cst_37 {dimension_numbers = #tpu.dot_dimension_numbers<[1], [0], [0], [1], [0, 0, 1, 1], [], []>} : vector<16x64xf32>, vector<64x64xf32>, vector<16x64xf32> -> vector<16x64xf32>
    %c1_38 = arith.constant 1 : index
    %c0_39 = arith.constant 0 : index
    %c0_40 = arith.constant 0 : index
    %74 = vector.load %arg8[%c1_38, %c0_39, %c0_40] : memref<3x64x64xf32, #tpu.memory_space<vmem>>, vector<1x64x64xf32>
    %75 = vector.shape_cast %74 : vector<1x64x64xf32> to vector<64x64xf32>
    %cst_41 = arith.constant dense<0.000000e+00> : vector<16x64xf32>
    %76 = tpu.matmul %68, %75, %cst_41 {dimension_numbers = #tpu.dot_dimension_numbers<[1], [0], [0], [1], [0, 0, 1, 1], [], []>} : vector<16x64xf32>, vector<64x64xf32>, vector<16x64xf32> -> vector<16x64xf32>
    %77 = arith.addf %73, %76 : vector<16x64xf32>
    %c2_42 = arith.constant 2 : index
    %c0_43 = arith.constant 0 : index
    %c0_44 = arith.constant 0 : index
    %78 = vector.load %arg8[%c2_42, %c0_43, %c0_44] : memref<3x64x64xf32, #tpu.memory_space<vmem>>, vector<1x64x64xf32>
    %79 = vector.shape_cast %78 : vector<1x64x64xf32> to vector<64x64xf32>
    %cst_45 = arith.constant dense<0.000000e+00> : vector<16x64xf32>
    %80 = tpu.matmul %70, %79, %cst_45 {dimension_numbers = #tpu.dot_dimension_numbers<[1], [0], [0], [1], [0, 0, 1, 1], [], []>} : vector<16x64xf32>, vector<64x64xf32>, vector<16x64xf32> -> vector<16x64xf32>
    %81 = arith.addf %77, %80 : vector<16x64xf32>
    %c0_46 = arith.constant 0 : index
    %c0_47 = arith.constant 0 : index
    %82 = vector.load %arg9[%c0_46, %c0_47] : memref<1x64xf32, #tpu.memory_space<vmem>>, vector<1x64xf32>
    %83 = vector.broadcast %82 : vector<1x64xf32> to vector<16x64xf32>
    %84 = arith.addf %81, %83 : vector<16x64xf32>
    %cst_48 = arith.constant 0.000000e+00 : f32
    %85 = vector.broadcast %cst_48 : f32 to vector<16x64xf32>
    %86 = arith.maximumf %84, %85 : vector<16x64xf32>
    %c0_49 = arith.constant 0 : index
    %c0_50 = arith.constant 0 : index
    %87 = vector.load %arg10[%c0_49, %c0_50] : memref<64x128xf32, #tpu.memory_space<vmem>>, vector<64x128xf32>
    %cst_51 = arith.constant dense<0.000000e+00> : vector<16x128xf32>
    %88 = tpu.matmul %86, %87, %cst_51 {dimension_numbers = #tpu.dot_dimension_numbers<[1], [0], [0], [1], [0, 0, 1, 1], [], []>} : vector<16x64xf32>, vector<64x128xf32>, vector<16x128xf32> -> vector<16x128xf32>
    %c0_52 = arith.constant 0 : index
    %c0_53 = arith.constant 0 : index
    %89 = vector.load %arg11[%c0_52, %c0_53] : memref<1x128xf32, #tpu.memory_space<vmem>>, vector<1x128xf32>
    %90 = vector.broadcast %89 : vector<1x128xf32> to vector<16x128xf32>
    %91 = arith.addf %88, %90 : vector<16x128xf32>
    %c0_54 = arith.constant 0 : index
    %c0_55 = arith.constant 0 : index
    %92 = vector.load %arg12[%c0_54, %c0_55] : memref<16x128xf32, #tpu.memory_space<vmem>>, vector<16x128xf32>
    tpu.vector_store %arg12[%c0_54, %c0_55], %91 {strides = array<i32>} : memref<16x128xf32, #tpu.memory_space<vmem>>, vector<16x128xf32>,
    return
  }
  func.func @transform_0(%arg0: i32) -> (i32, i32) {
    %c0_i32 = arith.constant 0 : i32
    %c0_i32_0 = arith.constant 0 : i32
    return %arg0, %c0_i32 : i32, i32
  }
  func.func @transform_1(%arg0: i32) -> (i32, i32) {
    %c0_i32 = arith.constant 0 : i32
    %c0_i32_0 = arith.constant 0 : i32
    %c0_i32_1 = arith.constant 0 : i32
    return %c0_i32, %c0_i32_0 : i32, i32
  }
  func.func @transform_2(%arg0: i32) -> (i32, i32) {
    %c0_i32 = arith.constant 0 : i32
    %c0_i32_0 = arith.constant 0 : i32
    %c0_i32_1 = arith.constant 0 : i32
    return %c0_i32, %c0_i32_0 : i32, i32
  }
  func.func @transform_3(%arg0: i32) -> (i32, i32) {
    %c0_i32 = arith.constant 0 : i32
    %c0_i32_0 = arith.constant 0 : i32
    %c0_i32_1 = arith.constant 0 : i32
    return %c0_i32, %c0_i32_0 : i32, i32
  }
  func.func @transform_4(%arg0: i32) -> (i32, i32) {
    %c0_i32 = arith.constant 0 : i32
    %c0_i32_0 = arith.constant 0 : i32
    %c0_i32_1 = arith.constant 0 : i32
    return %c0_i32, %c0_i32_0 : i32, i32
  }
  func.func @transform_5(%arg0: i32) -> (i32, i32) {
    %c0_i32 = arith.constant 0 : i32
    %c0_i32_0 = arith.constant 0 : i32
    %c0_i32_1 = arith.constant 0 : i32
    return %c0_i32, %c0_i32_0 : i32, i32
  }
  func.func @transform_6(%arg0: i32) -> (i32, i32) {
    %c0_i32 = arith.constant 0 : i32
    %c0_i32_0 = arith.constant 0 : i32
    %c0_i32_1 = arith.constant 0 : i32
    return %c0_i32, %c0_i32_0 : i32, i32
  }
  func.func @transform_7(%arg0: i32) -> (i32, i32, i32) {
    %c0_i32 = arith.constant 0 : i32
    %c0_i32_0 = arith.constant 0 : i32
    %c0_i32_1 = arith.constant 0 : i32
    %c0_i32_2 = arith.constant 0 : i32
    return %c0_i32, %c0_i32_0, %c0_i32_1 : i32, i32, i32
  }
  func.func @transform_8(%arg0: i32) -> (i32, i32) {
    %c0_i32 = arith.constant 0 : i32
    %c0_i32_0 = arith.constant 0 : i32
    %c0_i32_1 = arith.constant 0 : i32
    return %c0_i32, %c0_i32_0 : i32, i32
  }
  func.func @transform_9(%arg0: i32) -> (i32, i32) {
    %c0_i32 = arith.constant 0 : i32
    %c0_i32_0 = arith.constant 0 : i32
    %c0_i32_1 = arith.constant 0 : i32
    return %c0_i32, %c0_i32_0 : i32, i32
  }
  func.func @transform_10(%arg0: i32) -> (i32, i32) {
    %c0_i32 = arith.constant 0 : i32
    %c0_i32_0 = arith.constant 0 : i32
    %c0_i32_1 = arith.constant 0 : i32
    return %c0_i32, %c0_i32_0 : i32, i32
  }
  func.func @transform_11(%arg0: i32) -> (i32, i32) {
    %c0_i32 = arith.constant 0 : i32
    %c0_i32_0 = arith.constant 0 : i32
    return %arg0, %c0_i32 : i32, i32
  }
}

</mosaic_0001>

<bundles_post_ra>
// kernel: tpu_custom_call.1
= control target key start
LH: loop header
LB: loop body
LE: loop exit
PB: predicated region body
PF: predicated region fallthrough
CT: control target
= control target key end

     0   :  { %16 = vsyncpa [#allocation3], 0  ;;  %s2406_s0 = inlined_call_operand.hbm [shape: f32[16,32], index: 0, kind: input, shape index: {}]   ;;  %s2407_s1 = inlined_call_operand.hbm [shape: f32[32,512], index: 1, kind: input, shape index: {}]   ;;  %s2408_s2 = inlined_call_operand.vmem [shape: f32[1,512], index: 2, kind: input, shape index: {}]   ;;  %s2409_s3 = inlined_call_operand.hbm [shape: f32[256,256], index: 3, kind: input, shape index: {}]   ;;  %s2410_s4 = inlined_call_operand.hbm [shape: f32[3,128], index: 4, kind: input, shape index: {}]   ;;  %s2411_s5 = inlined_call_operand.hbm [shape: f32[128,128], index: 5, kind: input, shape index: {}]   ;;  %s2412_s6 = inlined_call_operand.vmem [shape: f32[5,64], index: 6, kind: input, shape index: {}]   ;;  %s2413_s7 = inlined_call_operand.hbm [shape: f32[3,64,64], index: 7, kind: input, shape index: {}]   ;;  %s2414_s8 = inlined_call_operand.vmem [shape: f32[1,64], index: 8, kind: input, shape index: {}]   ;;  %s2415_s9 = inlined_call_operand.hbm [shape: f32[64,128], index: 9, kind: input, shape index: {}]   ;;  %s2416_s10 = inlined_call_operand.vmem [shape: f32[1,128], index: 10, kind: input, shape index: {}]   ;;  %s2417_s11 = inlined_call_operand.hbm [shape: f32[16,128], index: 11, kind: output, shape index: {}]  }
   0x1   :  { %17 = vsyncpa [#allocation6], 0 }
   0x2   :  { %18 = vsyncpa [#allocation9], 0 }
   0x3   :  { %19 = vsyncpa [#allocation12], 0 }
   0x4   :  { %20 = vsyncpa [#allocation4], 0  ;;  %s2116_s17 = smov [#allocation5]   ;;  %s1930_s21 = scalar_lea.hbm %s2407_s1, 2048 }
   0x5   :  { %s38_s18 = sshll.u32 %s2116_s17, 4  ;;  %p1931_p0 = scmp.ne.s32.totalorder %s2407_s1, %s1930_s21  ;;  %s39_s18 = int_to_ptr.vmem [resolvable:$true] %s38_s18 }
   0x6   :  { %p1934_p1 = scmp.lt.u32.totalorder %s1930_s21, %s2407_s1 }
   0x8   :  { %p1936_p2 = pnand %p1934_p1, %p1931_p0 }
   0xa   :  { %1939 = shalt.err (!%p1936_p2)
}
   0xb   :  { %s1940_s26 = scalar_lea.vmem %s39_s18, 2048  ;;  %p1945_p4 = scmp.lt.s32.totalorder %s39_s18, %s39_s18 }
   0xc   :  { %p1941_p3 = scmp.ne.s32.totalorder %s39_s18, %s1940_s26  ;;  %p1946_p5 = scmp.lt.s32.totalorder %s1940_s26, %s1940_s26 }
   0xe   :  { %p1947_p6 = por %p1946_p5, %p1945_p4 }
  0x10   :  { %p1948_p7 = pnand %p1947_p6, %p1941_p3 }
  0x12   :  { %1951 = shalt.err (!%p1948_p7)
}
  0x13   :  { %s2117_s27 = smov 512   ;;  %s2118_s28 = smov 32  }
  0x14   :  { %44 = dma.hbm_to_vmem [thread:$0]  %s2407_s1, 2048, %s39_s18, [#allocation6], %s2117_s27, %s2117_s27, %s2118_s28  }
  0x15   :  { %s2119_s12 = smov [#allocation8]   ;;  %s1952_s16 = scalar_lea.hbm %s2410_s4, 64 }
  0x16   :  { %s65_s13 = sshll.u32 %s2119_s12, 4  ;;  %p1953_p8 = scmp.ne.s32.totalorder %s2410_s4, %s1952_s16  ;;  %s66_s13 = int_to_ptr.vmem [resolvable:$true] %s65_s13 }
  0x17   :  { %p1956_p9 = scmp.lt.u32.totalorder %s1952_s16, %s2410_s4 }
  0x19   :  { %p1958_p10 = pnand %p1956_p9, %p1953_p8 }
  0x1b   :  { %1961 = shalt.err (!%p1958_p10)
}
  0x1c   :  { %s1962_s22 = scalar_lea.vmem %s66_s13, 64  ;;  %p1967_p12 = scmp.lt.s32.totalorder %s66_s13, %s66_s13 }
  0x1d   :  { %p1963_p11 = scmp.ne.s32.totalorder %s66_s13, %s1962_s22  ;;  %p1968_p13 = scmp.lt.s32.totalorder %s1962_s22, %s1962_s22 }
  0x1f   :  { %p1969_p0 = por %p1968_p13, %p1967_p12 }
  0x21   :  { %p1970_p1 = pnand %p1969_p0, %p1963_p11 }
  0x23   :  { %1973 = shalt.err (!%p1970_p1)
}
  0x24   :  { %68 = dma.hbm_to_vmem [thread:$0]  %s2410_s4, 64, %s66_s13, [#allocation9]  }
  0x25   :  { %s2120_s23 = smov [#allocation11]   ;;  %s2121_s25 = smov [#allocation2]  }
  0x26   :  { %s88_s24 = sshll.u32 %s2120_s23, 4  ;;  %s26_s26 = sshll.u32 %s2121_s25, 4  ;;  %s89_s24 = int_to_ptr.vmem [resolvable:$true] %s88_s24  ;;  %s2216_s26 = int_to_ptr.vmem [resolvable:$true] %s26_s26 }
  0x27   :  { %s1974_s29 = scalar_lea.hbm %s2413_s7, 3072 }
  0x28   :  { %p1975_p2 = scmp.ne.s32.totalorder %s2413_s7, %s1974_s29  ;;  %p1978_p3 = scmp.lt.u32.totalorder %s1974_s29, %s2413_s7 }
  0x2a   :  { %p1980_p4 = pnand %p1978_p3, %p1975_p2 }
  0x2c   :  { %1983 = shalt.err (!%p1980_p4)
}
  0x2d   :  { %s1984_s4 = scalar_lea.vmem %s89_s24, 3072  ;;  %p1989_p6 = scmp.lt.s32.totalorder %s89_s24, %s89_s24 }
  0x2e   :  { %p1985_p5 = scmp.ne.s32.totalorder %s89_s24, %s1984_s4  ;;  %p1990_p7 = scmp.lt.s32.totalorder %s1984_s4, %s1984_s4 }
  0x30   :  { %p1991_p8 = por %p1990_p7, %p1989_p6 }
  0x32   :  { %p1992_p9 = pnand %p1991_p8, %p1985_p5 }
  0x34   :  { %1995 = shalt.err (!%p1992_p9)
}
  0x35   :  { %s2122_s13 = smov 128   ;;  %s2123_s16 = smov 8  }
  0x36   :  { %94 = dma.hbm_to_vmem [thread:$0]  %s2413_s7, 3072, %s89_s24, [#allocation12], %s2122_s13, %s2122_s13, %s2123_s16  }
  0x37   :  { %s1996_s22 = scalar_lea.hbm %s2406_s0, 256 }
  0x38   :  { %p1997_p10 = scmp.ne.s32.totalorder %s2406_s0, %s1996_s22  ;;  %p2000_p11 = scmp.lt.u32.totalorder %s1996_s22, %s2406_s0 }
  0x3a   :  { %p2002_p12 = pnand %p2000_p11, %p1997_p10 }
  0x3c   :  { %2005 = shalt.err (!%p2002_p12)
}
  0x3d   :  { %s2006_s27 = scalar_lea.vmem %s2216_s26, 256  ;;  %p2011_p0 = scmp.lt.s32.totalorder %s2216_s26, %s2216_s26 }
  0x3e   :  { %p2007_p13 = scmp.ne.s32.totalorder %s2216_s26, %s2006_s27  ;;  %p2012_p1 = scmp.lt.s32.totalorder %s2006_s27, %s2006_s27 }
  0x40   :  { %p2013_p2 = por %p2012_p1, %p2011_p0 }
  0x42   :  { %p2014_p3 = pnand %p2013_p2, %p2007_p13 }
  0x44   :  { %2017 = shalt.err (!%p2014_p3)
}
  0x45   :  { %32 = dma.hbm_to_vmem [thread:$0]  %s2406_s0, 256, %s2216_s26, [#allocation3], %s2122_s13, %s2122_s13, %s2123_s16  }
  0x46   :  { %s2124_s28 = smov [#allocation7]   ;;  %s2018_s14 = scalar_lea.hbm %s2409_s3, 8192 }
  0x47   :  { %s52_s29 = sshll.u32 %s2124_s28, 4  ;;  %p2019_p4 = scmp.ne.s32.totalorder %s2409_s3, %s2018_s14  ;;  %s53_s29 = int_to_ptr.vmem [resolvable:$true] %s52_s29 }
  0x48   :  { %p2022_p5 = scmp.lt.u32.totalorder %s2018_s14, %s2409_s3 }
  0x4a   :  { %p2024_p6 = pnand %p2022_p5, %p2019_p4 }
  0x4c   :  { %2027 = shalt.err (!%p2024_p6)
}
  0x4d   :  { %s2028_s20 = scalar_lea.vmem %s53_s29, 8192  ;;  %p2033_p8 = scmp.lt.s32.totalorder %s53_s29, %s53_s29 }
  0x4e   :  { %p2029_p7 = scmp.ne.s32.totalorder %s53_s29, %s2028_s20  ;;  %p2034_p9 = scmp.lt.s32.totalorder %s2028_s20, %s2028_s20 }
  0x50   :  { %p2035_p10 = por %p2034_p9, %p2033_p8 }
  0x52   :  { %p2036_p11 = pnand %p2035_p10, %p2029_p7 }
  0x54   :  { %2039 = shalt.err (!%p2036_p11)
}
  0x55   :  { %s2125_s0 = smov 256   ;;  %s2126_s26 = smov 16  }
  0x56   :  { %58 = dma.hbm_to_vmem [thread:$0]  %s2409_s3, 8192, %s53_s29, [#allocation6], %s2125_s0, %s2125_s0, %s2126_s26  }
  0x57   :  { %s2127_s1 = smov [#allocation10]   ;;  %s2128_s23 = smov [#allocation13]  }
  0x58   :  { %s74_s18 = sshll.u32 %s2127_s1, 4  ;;  %s102_s25 = sshll.u32 %s2128_s23, 4  ;;  %s75_s18 = int_to_ptr.vmem [resolvable:$true] %s74_s18  ;;  %s103_s25 = int_to_ptr.vmem [resolvable:$true] %s102_s25 }
  0x59   :  { %s2040_s24 = scalar_lea.hbm %s2411_s5, 2048 }
  0x5a   :  { %p2041_p12 = scmp.ne.s32.totalorder %s2411_s5, %s2040_s24  ;;  %p2044_p13 = scmp.lt.u32.totalorder %s2040_s24, %s2411_s5 }
  0x5c   :  { %p2046_p0 = pnand %p2044_p13, %p2041_p12 }
  0x5e   :  { %2049 = shalt.err (!%p2046_p0)
}
  0x5f   :  { %s2050_s3 = scalar_lea.vmem %s75_s18, 2048  ;;  %p2055_p2 = scmp.lt.s32.totalorder %s75_s18, %s75_s18 }
  0x60   :  { %p2051_p1 = scmp.ne.s32.totalorder %s75_s18, %s2050_s3  ;;  %p2056_p3 = scmp.lt.s32.totalorder %s2050_s3, %s2050_s3 }
  0x62   :  { %p2057_p4 = por %p2056_p3, %p2055_p2 }
  0x64   :  { %p2058_p5 = pnand %p2057_p4, %p2051_p1 }
  0x66   :  { %2061 = shalt.err (!%p2058_p5)
}
  0x67   :  { %80 = dma.hbm_to_vmem [thread:$0]  %s2411_s5, 2048, %s75_s18, [#allocation9], %s2122_s13, %s2122_s13, %s2123_s16  }
  0x68   :  { %s2062_s19 = scalar_lea.hbm %s2415_s9, 1024 }
  0x69   :  { %p2063_p6 = scmp.ne.s32.totalorder %s2415_s9, %s2062_s19  ;;  %p2066_p7 = scmp.lt.u32.totalorder %s2062_s19, %s2415_s9 }
  0x6b   :  { %p2068_p8 = pnand %p2066_p7, %p2063_p6 }
  0x6d   :  { %2071 = shalt.err (!%p2068_p8)
}
  0x6e   :  { %s2072_s22 = scalar_lea.vmem %s103_s25, 1024  ;;  %p2077_p10 = scmp.lt.s32.totalorder %s103_s25, %s103_s25 }
  0x6f   :  { %p2073_p9 = scmp.ne.s32.totalorder %s103_s25, %s2072_s22  ;;  %p2078_p11 = scmp.lt.s32.totalorder %s2072_s22, %s2072_s22 }
  0x71   :  { %p2079_p12 = por %p2078_p11, %p2077_p10 }
  0x73   :  { %p2080_p13 = pnand %p2079_p12, %p2073_p9 }
  0x75   :  { %2083 = shalt.err (!%p2080_p13)
}
  0x76   :  { %108 = dma.hbm_to_vmem [thread:$0]  %s2415_s9, 1024, %s103_s25, [#allocation12], %s2122_s13, %s2122_s13, %s2123_s16  }
  0x77   :  { %2106 = dma.done.wait [#allocation3], 256  }
  0x78   :  { %2107 = vsyncadd [#allocation3], 4294967040 }
  0x79   :  { %2108 = dma.done.wait [#allocation6], 10240  }
  0x7a   :  { %2109 = vsyncadd [#allocation6], 4294957056 }
  0x7b   :  { %2110 = dma.done.wait [#allocation9], 2112  }
  0x7c   :  { %2111 = vsyncadd [#allocation9], 4294965184 }
  0x7d   :  { %2112 = dma.done.wait [#allocation12], 4096  }
  0x7e   :  { %2113 = vsyncadd [#allocation12], 4294963200  ;;  %v2129_v0 = vmov 0.0   ;;  %v135_v1 = vld [vmem:[#allocation5 + $0x8] sm:$0xff]  ;;  %v137_v3 = vld [vmem:[#allocation5 + $0x18] sm:$0xff]  ;;  %vm172_vm0 = vcmask 261120  }
  0x7f   :  { %243 = vmatprep.mubr.f32.mxu0 %v2129_v0  ;;  %320 = vmatprep.mubr.f32.mxu1 %v2129_v0  ;;  %v139_v2 = vld [vmem:[#allocation5 + $0x28] sm:$0xff]  ;;  %v141_v5 = vld [vmem:[#allocation5 + $0x38] sm:$0xff]  ;;  %v134_v6 = vld [vmem:[#allocation5] sm:$0xff]  ;;  %s2130_s25 = smov 64   ;;  %vm921_vm1 = vcmask 523264   ;;  %s2131_s17 = smov [#allocation14]  }
  0x80   :  { %v1606_v4 = vpack.c.bf16 %v139_v2, %v135_v1  ;;  %v138_v7 = vld [vmem:[#allocation5 + $0x20] sm:$0xff]  ;;  %v1614_v8 = vpack.c.bf16 %v141_v5, %v137_v3  ;;  %v136_v10 = vld [vmem:[#allocation5 + $0x10] sm:$0xff]  ;;  %v143_v12 = vld [vmem:[#allocation5 + $0x48] sm:$0xff]  ;;  %s1294_s19 = sshll.u32 %s2131_s17, 4  ;;  %s1295_s19 = int_to_ptr.vmem [resolvable:$true] %s1294_s19 }
  0x81   :  { %v1608_v9 = vpack.c.bf16 %v138_v7, %v134_v6  ;;  %v140_v11 = vld [vmem:[#allocation5 + $0x30] sm:$0xff]  ;;  %v147_v14 = vld [vmem:[#allocation5 + $0x68] sm:$0xff]  ;;  %v145_v15 = vld [vmem:[#allocation5 + $0x58] sm:$0xff]  ;;  %p2089_p1 = scmp.lt.s32.totalorder %s1295_s19, %s1295_s19 }
  0x82   :  { %1607 = vmatprep.subr.bf16.mxu0 %v1606_v4  ;;  %v1616_v13 = vpack.c.bf16 %v140_v11, %v136_v10  ;;  %v149_v16 = vld [vmem:[#allocation5 + $0x78] sm:$0xff]  ;;  %1615 = vmatprep.subr.bf16.mxu1 %v1614_v8  ;;  %v1610_v17 = vpack.c.bf16 %v147_v14, %v143_v12  ;;  %v142_v19 = vld [vmem:[#allocation5 + $0x40] sm:$0xff]  ;;  %v144_v21 = vld [vmem:[#allocation5 + $0x50] sm:$0xff] }
  0x83   :  { %1609 = vmatpush1.bf16.msra.mxu0 %v1608_v9  ;;  %v1618_v18 = vpack.c.bf16 %v149_v16, %v145_v15  ;;  %v146_v20 = vld [vmem:[#allocation5 + $0x60] sm:$0xff]  ;;  %v148_v23 = vld [vmem:[#allocation5 + $0x70] sm:$0xff]  ;;  %v342_v25 = vld [vmem:[#allocation7 + $0x8] sm:$0xff] }
  0x84   :  { %1617 = vmatpush1.bf16.msra.mxu1 %v1616_v13  ;;  %v1612_v22 = vpack.c.bf16 %v146_v20, %v142_v19  ;;  %1611 = vmatprep.subr.bf16.mxu0 %v1610_v17  ;;  %v1620_v24 = vpack.c.bf16 %v148_v23, %v144_v21  ;;  %v344_v26 = vld [vmem:[#allocation7 + $0x18] sm:$0xff]  ;;  %v341_v27 = vld [vmem:[#allocation7] sm:$0xff]  ;;  %v343_v29 = vld [vmem:[#allocation7 + $0x10] sm:$0xff] }
  0x85   :  { %1619 = vmatprep.subr.bf16.mxu1 %v1618_v18  ;;  %v1622_v28 = vpack.c.bf16 %v344_v26, %v342_v25  ;;  %v346_v30 = vld [vmem:[#allocation7 + $0x28] sm:$0xff]  ;;  %v348_v31 = vld [vmem:[#allocation7 + $0x38] sm:$0xff]  ;;  %v132_v32 = vld [vmem:[#allocation2] sm:$0xff]  ;;  %v1624_v33 = vpack.c.bf16 %v343_v29, %v341_v27 }
  0x86   :  { %v1626_v34 = vpack.c.bf16 %v348_v31, %v346_v30  ;;  %v345_v35 = vld [vmem:[#allocation7 + $0x20] sm:$0xff]  ;;  %v347_v36 = vld [vmem:[#allocation7 + $0x30] sm:$0xff]  ;;  %v350_v37 = vld [vmem:[#allocation7 + $0x48] sm:$0xff] }
  0x87   :  { %1613 = vmatpush1.bf16.msra.mxu0 %v1612_v22  ;;  %v352_v38 = vld [vmem:[#allocation7 + $0x58] sm:$0xff]  ;;  %v1628_v40 = vpack.c.bf16 %v347_v36, %v345_v35  ;;  %v349_v42 = vld [vmem:[#allocation7 + $0x40] sm:$0xff]  ;;  %v351_v43 = vld [vmem:[#allocation7 + $0x50] sm:$0xff] }
  0x88   :  { %1621 = vmatpush1.bf16.msra.mxu1 %v1620_v24  ;;  %1623 = vmatprep.subr.bf16.mxu0 %v1622_v28  ;;  %v133_v39 = vld [vmem:[#allocation2 + $0x8] sm:$0xff]  ;;  %v1630_v41 = vpack.c.bf16 %v352_v38, %v350_v37  ;;  %v354_v44 = vld [vmem:[#allocation7 + $0x68] sm:$0xff]  ;;  %v1632_v46 = vpack.c.bf16 %v351_v43, %v349_v42  ;;  %v353_v48 = vld [vmem:[#allocation7 + $0x60] sm:$0xff] }
  0x89   :  { %1687 = vmatprep.subr.bf16.mxu1 %v1622_v28  ;;  %v356_v45 = vld [vmem:[#allocation7 + $0x78] sm:$0xff]  ;;  %v355_v49 = vld [vmem:[#allocation7 + $0x70] sm:$0xff]  ;;  %v358_v50 = vld [vmem:[#allocation7 + $0x88] sm:$0xff] }
  0x8a   :  { %1309 = vmatmul.mubr.msk.f32.vlgmr.msra.gmra.mrb[0].mxu0 %vm172_vm0, %v132_v32  ;;  %v1634_v47 = vpack.c.bf16 %v356_v45, %v354_v44  ;;  %v360_v51 = vld [vmem:[#allocation7 + $0x98] sm:$0xff]  ;;  %v1636_v52 = vpack.c.bf16 %v355_v49, %v353_v48  ;;  %v357_v54 = vld [vmem:[#allocation7 + $0x80] sm:$0xff]  ;;  %v359_v55 = vld [vmem:[#allocation7 + $0x90] sm:$0xff] }
  0x8b   :  { %1311 = vmatmul.mubr.msk.f32.vlgmr.msra.gmra.mrb[0].mxu1 %vm172_vm0, %v132_v32  ;;  %249 = vmatprep.mubr.f32.mxu0 %v2129_v0  ;;  %v1638_v53 = vpack.c.bf16 %v360_v51, %v358_v50  ;;  %v362_v56 = vld [vmem:[#allocation7 + $0xa8] sm:$0xff]  ;;  %v364_v57 = vld [vmem:[#allocation7 + $0xb8] sm:$0xff]  ;;  %v1640_v58 = vpack.c.bf16 %v359_v55, %v357_v54  ;;  %v361_v60 = vld [vmem:[#allocation7 + $0xa0] sm:$0xff] }
  0x8c   :  { %326 = vmatprep.mubr.f32.mxu1 %v2129_v0  ;;  %1625 = vmatpush1.bf16.msra.mxu0 %v1624_v33  ;;  %v1642_v59 = vpack.c.bf16 %v364_v57, %v362_v56  ;;  %v363_v61 = vld [vmem:[#allocation7 + $0xb0] sm:$0xff]  ;;  %v366_v62 = vld [vmem:[#allocation7 + $0xc8] sm:$0xff]  ;;  %v368_v63 = vld [vmem:[#allocation7 + $0xd8] sm:$0xff] }
  0x8d   :  { %1689 = vmatpush1.bf16.msra.mxu1 %v1624_v33  ;;  %1627 = vmatprep.subr.bf16.mxu0 %v1626_v34  ;;  %v1644_v0 = vpack.c.bf16 %v363_v61, %v361_v60  ;;  %v1646_v1 = vpack.c.bf16 %v368_v63, %v366_v62  ;;  %v365_v2 = vld [vmem:[#allocation7 + $0xc0] sm:$0xff]  ;;  %v367_v3 = vld [vmem:[#allocation7 + $0xd0] sm:$0xff]  ;;  %v370_v4 = vld [vmem:[#allocation7 + $0xe8] sm:$0xff]  ;;  %v152_v62 = vlaneseq }
  0x8e   :  { %1310 = vmatmul.mubr.msk.f32.gmra.mrb[2].mxu0 %vm172_vm0, %v133_v39  ;;  %1691 = vmatprep.subr.bf16.mxu1 %v1626_v34  ;;  %v372_v5 = vld [vmem:[#allocation7 + $0xf8] sm:$0xff]  ;;  %v1648_v6 = vpack.c.bf16 %v367_v3, %v365_v2  ;;  %v369_v8 = vld [vmem:[#allocation7 + $0xe0] sm:$0xff]  ;;  %v371_v9 = vld [vmem:[#allocation7 + $0xf0] sm:$0xff] }
  0x8f   :  { %1312 = vmatmul.mubr.msk.f32.gmra.mrb[2].mxu1 %vm172_vm0, %v133_v39  ;;  %v1650_v7 = vpack.c.bf16 %v372_v5, %v370_v4  ;;  %v374_v10 = vld [vmem:[#allocation7 + $0x108] sm:$0xff]  ;;  %v376_v11 = vld [vmem:[#allocation7 + $0x118] sm:$0xff]  ;;  %v1652_v12 = vpack.c.bf16 %v371_v9, %v369_v8  ;;  %v373_v14 = vld [vmem:[#allocation7 + $0x100] sm:$0xff]  ;;  %v153_v63 = vshrl.u32 %v152_v62, 7 }
  0x90   :  { %1629 = vmatpush1.bf16.msra.mxu0 %v1628_v40  ;;  %v1654_v13 = vpack.c.bf16 %v376_v11, %v374_v10  ;;  %v375_v15 = vld [vmem:[#allocation7 + $0x110] sm:$0xff]  ;;  %v378_v16 = vld [vmem:[#allocation7 + $0x128] sm:$0xff]  ;;  %v380_v17 = vld [vmem:[#allocation7 + $0x138] sm:$0xff] }
  0x91   :  { %1693 = vmatpush1.bf16.msra.mxu1 %v1628_v40  ;;  %1631 = vmatprep.subr.bf16.mxu0 %v1630_v41  ;;  %v1656_v18 = vpack.c.bf16 %v375_v15, %v373_v14  ;;  %v1658_v19 = vpack.c.bf16 %v380_v17, %v378_v16  ;;  %v377_v20 = vld [vmem:[#allocation7 + $0x120] sm:$0xff]  ;;  %v379_v21 = vld [vmem:[#allocation7 + $0x130] sm:$0xff]  ;;  %v382_v22 = vld [vmem:[#allocation7 + $0x148] sm:$0xff]  ;;  %v162_v2 = vsub.s32 2, %v153_v63  ;;  %v158_v3 = vsub.s32 1, %v153_v63 }
  0x92   :  { %1695 = vmatprep.subr.bf16.mxu1 %v1630_v41  ;;  %v384_v23 = vld [vmem:[#allocation7 + $0x158] sm:$0xff]  ;;  %v1660_v24 = vpack.c.bf16 %v379_v21, %v377_v20  ;;  %v381_v26 = vld [vmem:[#allocation7 + $0x140] sm:$0xff]  ;;  %v383_v27 = vld [vmem:[#allocation7 + $0x150] sm:$0xff]  ;;  %v166_v4 = vsub.s32 3, %v153_v63 }
  0x93   :  { %v1662_v25 = vpack.c.bf16 %v384_v23, %v382_v22  ;;  %v386_v28 = vld [vmem:[#allocation7 + $0x168] sm:$0xff]  ;;  %v388_v29 = vld [vmem:[#allocation7 + $0x178] sm:$0xff]  ;;  %v1664_v30 = vpack.c.bf16 %v383_v27, %v381_v26  ;;  %v385_v32 = vld [vmem:[#allocation7 + $0x160] sm:$0xff] }
  0x94   :  { %1633 = vmatpush1.bf16.msra.mxu0 %v1632_v46  ;;  %v1666_v31 = vpack.c.bf16 %v388_v29, %v386_v28  ;;  %v387_v33 = vld [vmem:[#allocation7 + $0x170] sm:$0xff]  ;;  %v390_v34 = vld [vmem:[#allocation7 + $0x188] sm:$0xff]  ;;  %v392_v35 = vld [vmem:[#allocation7 + $0x198] sm:$0xff] }
  0x95   :  { %1697 = vmatpush1.bf16.msra.mxu1 %v1632_v46  ;;  %1635 = vmatprep.subr.bf16.mxu0 %v1634_v47  ;;  %v1668_v36 = vpack.c.bf16 %v387_v33, %v385_v32  ;;  %v1670_v37 = vpack.c.bf16 %v392_v35, %v390_v34  ;;  %v389_v38 = vld [vmem:[#allocation7 + $0x180] sm:$0xff]  ;;  %v391_v39 = vld [vmem:[#allocation7 + $0x190] sm:$0xff]  ;;  %v394_v40 = vld [vmem:[#allocation7 + $0x1a8] sm:$0xff] }
  0x96   :  { %1699 = vmatprep.subr.bf16.mxu1 %v1634_v47  ;;  %v396_v41 = vld [vmem:[#allocation7 + $0x1b8] sm:$0xff]  ;;  %v1672_v42 = vpack.c.bf16 %v391_v39, %v389_v38  ;;  %v393_v44 = vld [vmem:[#allocation7 + $0x1a0] sm:$0xff]  ;;  %v395_v45 = vld [vmem:[#allocation7 + $0x1b0] sm:$0xff] }
  0x97   :  { %v1674_v43 = vpack.c.bf16 %v396_v41, %v394_v40  ;;  %v398_v46 = vld [vmem:[#allocation7 + $0x1c8] sm:$0xff]  ;;  %v400_v47 = vld [vmem:[#allocation7 + $0x1d8] sm:$0xff]  ;;  %v1676_v48 = vpack.c.bf16 %v395_v45, %v393_v44  ;;  %v397_v50 = vld [vmem:[#allocation7 + $0x1c0] sm:$0xff] }
  0x98   :  { %1637 = vmatpush1.bf16.msra.mxu0 %v1636_v52  ;;  %v1678_v49 = vpack.c.bf16 %v400_v47, %v398_v46  ;;  %v399_v51 = vld [vmem:[#allocation7 + $0x1d0] sm:$0xff]  ;;  %v404_v54 = vld [vmem:[#allocation7 + $0x1f8] sm:$0xff]  ;;  %v401_v56 = vld [vmem:[#allocation7 + $0x1e0] sm:$0xff] }
  0x99   :  { %1701 = vmatpush1.bf16.msra.mxu1 %v1636_v52  ;;  %1639 = vmatprep.subr.bf16.mxu0 %v1638_v53  ;;  %v1680_v52 = vpack.c.bf16 %v399_v51, %v397_v50  ;;  %v403_v57 = vld [vmem:[#allocation7 + $0x1f0] sm:$0xff]  ;;  %v591_v17 = vld [vmem:[#allocation10 + $0x18] sm:$0xff] }
  0x9a   :  { %1703 = vmatprep.subr.bf16.mxu1 %v1638_v53  ;;  %v402_v53 = vld [vmem:[#allocation7 + $0x1e8] sm:$0xff]  ;;  %v590_v16 = vld [vmem:[#allocation10 + $0x10] sm:$0xff]  ;;  %v595_v40 = vld [vmem:[#allocation10 + $0x38] sm:$0xff] }
  0x9b   :  { %v1682_v55 = vpack.c.bf16 %v404_v54, %v402_v53  ;;  %v589_v60 = vld [vmem:[#allocation10 + $0x8] sm:$0xff]  ;;  %v2306_v27 = vpack.c.bf16 %v591_v17, %v590_v16  ;;  %v594_v39 = vld [vmem:[#allocation10 + $0x30] sm:$0xff]  ;;  %v599_v46 = vld [vmem:[#allocation10 + $0x58] sm:$0xff] }
  0x9c   :  { %1641 = vmatpush1.bf16.msra.mxu0 %v1640_v58  ;;  %v593_v32 = vld [vmem:[#allocation10 + $0x28] sm:$0xff]  ;;  %v2317_v41 = vpack.c.bf16 %v595_v40, %v594_v39  ;;  %v598_v45 = vld [vmem:[#allocation10 + $0x50] sm:$0xff]  ;;  %v913_v17 = vld [vmem:[#allocation11 + $0x40] sm:$0xff] }
  0x9d   :  { %1705 = vmatpush1.bf16.msra.mxu1 %v1640_v58  ;;  %1643 = vmatprep.subr.bf16.mxu0 %v1642_v59  ;;  %v1684_v58 = vpack.c.bf16 %v403_v57, %v401_v56  ;;  %v2329_v47 = vpack.c.bf16 %v599_v46, %v598_v45  ;;  %v602_v51 = vld [vmem:[#allocation10 + $0x70] sm:$0xff]  ;;  %v1316_v54 = vld [vmem:[%s2412_s6 + $0x1] ss:$0 sm:$0xff]  ;;  %v1313_v56 = vld [vmem:[#allocation8 + $0x1] ss:$0 sm:$0xff] }
  0x9e   :  { %1707 = vmatprep.subr.bf16.mxu1 %v1642_v59  ;;  %v588_v59 = vld [vmem:[#allocation10] sm:$0xff]  ;;  %839 = vrot.lane.b32.xlu0 %v1316_v54, %s2130_s25  ;;  %v905_v39 = vld [vmem:[#allocation11 + $0x8] sm:$0xff] }
  0x9f   :  { %v2299_v61 = vpack.c.bf16 %v589_v60, %v588_v59  ;;  %v1191_v46 = vld [vmem:[#allocation13] sm:$0xff] }
  0xa0   :  { %1645 = vmatpush1.bf16.msra.mxu0 %v1644_v0 }
  0xa1   :  { %1709 = vmatpush1.bf16.msra.mxu1 %v1644_v0  ;;  %1647 = vmatprep.subr.bf16.mxu0 %v1646_v1  ;;  %v154_v0 = vsub.s32 0, %v153_v63 }
  0xa2   :  { %1711 = vmatprep.subr.bf16.mxu1 %v1646_v1  ;;  %v150_v1 = vld [vmem:[%s2408_s2] sm:$0xf] }
  0xa3   :  { %v155_v5 = vrot.slane %v150_v1, %v154_v0  ;;  %v167_v8 = vrot.slane %v150_v1, %v166_v4  ;;  %v1314_v0 = vld [vmem:[#allocation8] ss:$0 sm:$0xff] }
  0xa4   :  { %1649 = vmatpush1.bf16.msra.mxu0 %v1648_v6 }
  0xa5   :  { %1713 = vmatpush1.bf16.msra.mxu1 %v1648_v6  ;;  %1651 = vmatprep.subr.bf16.mxu0 %v1650_v7  ;;  %v163_v6 = vrot.slane %v150_v1, %v162_v2 }
  0xa6   :  { %1715 = vmatprep.subr.bf16.mxu1 %v1650_v7  ;;  %v159_v7 = vrot.slane %v150_v1, %v158_v3 }
  0xa8   :  { %1653 = vmatpush1.bf16.msra.mxu0 %v1652_v12 }
  0xa9   :  { %1717 = vmatpush1.bf16.msra.mxu1 %v1652_v12  ;;  %1655 = vmatprep.subr.bf16.mxu0 %v1654_v13 }
  0xaa   :  { %1719 = vmatprep.subr.bf16.mxu1 %v1654_v13 }
  0xac   :  { %1657 = vmatpush1.bf16.msra.mxu0 %v1656_v18 }
  0xad   :  { %1721 = vmatpush1.bf16.msra.mxu1 %v1656_v18  ;;  %1659 = vmatprep.subr.bf16.mxu0 %v1658_v19 }
  0xae   :  { %1723 = vmatprep.subr.bf16.mxu1 %v1658_v19 }
  0xb0   :  { %1661 = vmatpush1.bf16.msra.mxu0 %v1660_v24 }
  0xb1   :  { %1725 = vmatpush1.bf16.msra.mxu1 %v1660_v24  ;;  %1663 = vmatprep.subr.bf16.mxu0 %v1662_v25 }
  0xb2   :  { %1727 = vmatprep.subr.bf16.mxu1 %v1662_v25 }
  0xb4   :  { %1665 = vmatpush1.bf16.msra.mxu0 %v1664_v30 }
  0xb5   :  { %1729 = vmatpush1.bf16.msra.mxu1 %v1664_v30  ;;  %1667 = vmatprep.subr.bf16.mxu0 %v1666_v31 }
  0xb6   :  { %1731 = vmatprep.subr.bf16.mxu1 %v1666_v31  ;;  %v592_v31 = vld [vmem:[#allocation10 + $0x20] sm:$0xff] }
  0xb7   :  { %v2311_v38 = vpack.c.bf16 %v593_v32, %v592_v31  ;;  %v917_v32 = vld [vmem:[#allocation11 + $0x60] sm:$0xff] }
  0xb8   :  { %1669 = vmatpush1.bf16.msra.mxu0 %v1668_v36 }
  0xb9   :  { %1733 = vmatpush1.bf16.msra.mxu1 %v1668_v36  ;;  %1671 = vmatprep.subr.bf16.mxu0 %v1670_v37 }
  0xba   :  { %1735 = vmatprep.subr.bf16.mxu1 %v1670_v37 }
  0xbc   :  { %1673 = vmatpush1.bf16.msra.mxu0 %v1672_v42 }
  0xbd   :  { %1737 = vmatpush1.bf16.msra.mxu1 %v1672_v42  ;;  %1675 = vmatprep.subr.bf16.mxu0 %v1674_v43  ;;  %v596_v42 = vld [vmem:[#allocation10 + $0x40] sm:$0xff] }
  0xbe   :  { %1739 = vmatprep.subr.bf16.mxu1 %v1674_v43  ;;  %v597_v43 = vld [vmem:[#allocation10 + $0x48] sm:$0xff] }
  0xbf   :  { %v2323_v44 = vpack.c.bf16 %v597_v43, %v596_v42 }
  0xc0   :  { %1677 = vmatpush1.bf16.msra.mxu0 %v1676_v48 }
  0xc1   :  { %1741 = vmatpush1.bf16.msra.mxu1 %v1676_v48  ;;  %1679 = vmatprep.subr.bf16.mxu0 %v1678_v49  ;;  %v600_v48 = vld [vmem:[#allocation10 + $0x60] sm:$0xff] }
  0xc2   :  { %1743 = vmatprep.subr.bf16.mxu1 %v1678_v49  ;;  %v601_v49 = vld [vmem:[#allocation10 + $0x68] sm:$0xff] }
  0xc3   :  { %v1774_v50 = vpack.c.bf16 %v601_v49, %v600_v48  ;;  %v1193_v48 = vld [vmem:[#allocation13 + $0x10] sm:$0xff] }
  0xc4   :  { %1681 = vmatpush1.bf16.msra.mxu0 %v1680_v52 }
  0xc5   :  { %1745 = vmatpush1.bf16.msra.mxu1 %v1680_v52  ;;  %1683 = vmatprep.subr.bf16.mxu0 %v1682_v55  ;;  %v603_v52 = vld [vmem:[#allocation10 + $0x78] sm:$0xff] }
  0xc6   :  { %1747 = vmatprep.subr.bf16.mxu1 %v1682_v55  ;;  %v1778_v53 = vpack.c.bf16 %v603_v52, %v602_v51  ;;  %v1319_v55 = vld [vmem:[%s2412_s6 + $0x3] ss:$0 sm:$0xff]  ;;  %v1195_v52 = vld [vmem:[#allocation13 + $0x20] sm:$0xff] }
  0xc7   :  { %891 = vrot.lane.b32.xlu0 %v1319_v55, %s2130_s25 }
  0xc8   :  { %1685 = vmatpush1.bf16.msra.mxu0 %v1684_v58 }
  0xc9   :  { %1749 = vmatpush1.bf16.msra.mxu1 %v1684_v58  ;;  %1751 = vmatprep.subr.bf16.mxu0 %v2299_v61  ;;  %v1315_v58 = vld [vmem:[#allocation8 + $0x2] ss:$0 sm:$0xff] }
  0xca   :  { %1783 = vmatprep.subr.bf16.mxu1 %v2299_v61 }
 0x15d   :  { %v245_v9 = vpop.f32.mrb[0].mxu0 }
 0x15e   :  { %v246_v10 = vadd.f32 %v245_v9, %v155_v5  ;;  %v322_v11 = vpop.f32.mrb[0].mxu1  ;;  %v247_v12 = vpop.f32.mrb[1].mxu0 }
 0x15f   :  { %v323_v13 = vadd.f32 %v322_v11, %v163_v6  ;;  %v248_v14 = vadd.f32 %v247_v12, %v159_v7  ;;  %v324_v15 = vpop.f32.mrb[1].mxu1 }
 0x160   :  { %v325_v18 = vadd.f32 %v324_v15, %v167_v8  ;;  %v333_v22 = vmax.f32 %v246_v10, 0.0 }
 0x161   :  { %v335_v19 = vmax.f32 %v323_v13, 0.0  ;;  %v334_v20 = vmax.f32 %v248_v14, 0.0  ;;  %v251_v21 = vpop.f32.mrb[2].mxu0 }
 0x162   :  { %v336_v23 = vmax.f32 %v325_v18, 0.0  ;;  %v252_v24 = vadd.f32 %v251_v21, %v155_v5  ;;  %v328_v25 = vpop.f32.mrb[2].mxu1  ;;  %v253_v26 = vpop.f32.mrb[3].mxu0  ;;  %v914_v18 = vld [vmem:[#allocation11 + $0x48] sm:$0xff] }
 0x163   :  { %v329_v28 = vadd.f32 %v328_v25, %v163_v6  ;;  %v254_v29 = vadd.f32 %v253_v26, %v159_v7  ;;  %v330_v30 = vpop.f32.mrb[3].mxu1  ;;  %469 = vmatprep.mubr.f32.mxu0 %v334_v20  ;;  %v840_v20 = vpop.permute.xlu0 %839  ;;  %v1846_v21 = vpack.c.bf16 %v914_v18, %v913_v17  ;;  %v910_v17 = vld [vmem:[#allocation11 + $0x30] sm:$0xff]  ;;  %v911_v18 = vld [vmem:[#allocation11 + $0x38] sm:$0xff] }
 0x164   :  { %v331_v33 = vadd.f32 %v330_v30, %v167_v8  ;;  %546 = vmatprep.mubr.f32.mxu1 %v336_v23  ;;  %470 = vmatmul.mubr.f32.vlgmr.msra.gmra.mrb[4].mxu0 %v333_v22  ;;  %v337_v36 = vmax.f32 %v252_v24, 0.0  ;;  %v916_v22 = vld [vmem:[#allocation11 + $0x58] sm:$0xff] }
 0x165   :  { %v339_v34 = vmax.f32 %v329_v28, 0.0  ;;  %v338_v35 = vmax.f32 %v254_v29, 0.0  ;;  %547 = vmatmul.mubr.f32.vlgmr.msra.gmra.mrb[4].mxu1 %v335_v19  ;;  %1753 = vmatpush3.bf16.msra.mxu0 %v2299_v61  ;;  %v915_v19 = vld [vmem:[#allocation11 + $0x50] sm:$0xff] }
 0x166   :  { %v340_v37 = vmax.f32 %v331_v33, 0.0  ;;  %1755 = vmatprep.subr.bf16.mxu0 %v2306_v27  ;;  %1785 = vmatpush3.bf16.msra.mxu1 %v2299_v61  ;;  %v1850_v23 = vpack.c.bf16 %v916_v22, %v915_v19  ;;  %v918_v33 = vld [vmem:[#allocation11 + $0x68] sm:$0xff]  ;;  %v1089_v22 = vld [vmem:[#allocation11 + $0x80] sm:$0xff] }
 0x167   :  { %475 = vmatprep.mubr.f32.mxu0 %v338_v35  ;;  %1787 = vmatprep.subr.bf16.mxu1 %v2306_v27  ;;  %v892_v28 = vpop.permute.xlu0 %891  ;;  %v919_v35 = vld [vmem:[#allocation11 + $0x70] sm:$0xff]  ;;  %v1318_v19 = vld [vmem:[%s2412_s6 + $0x2] ss:$0 sm:$0xff] }
 0x168   :  { %552 = vmatprep.mubr.f32.mxu1 %v340_v37  ;;  %476 = vmatmul.mubr.f32.gmra.mrb[6].mxu0 %v337_v36  ;;  %v920_v36 = vld [vmem:[#allocation11 + $0x78] sm:$0xff] }
 0x169   :  { %553 = vmatmul.mubr.f32.gmra.mrb[6].mxu1 %v339_v34  ;;  %1757 = vmatpush3.bf16.msra.mxu0 %v2306_v27  ;;  %v1854_v34 = vpack.c.bf16 %v918_v33, %v917_v32  ;;  %v1858_v37 = vpack.c.bf16 %v920_v36, %v919_v35  ;;  %v1093_v32 = vld [vmem:[#allocation11 + $0xa0] sm:$0xff]  ;;  %v1094_v33 = vld [vmem:[#allocation11 + $0xa8] sm:$0xff]  ;;  %v1095_v35 = vld [vmem:[#allocation11 + $0xb0] sm:$0xff] }
 0x16a   :  { %1759 = vmatprep.subr.bf16.mxu0 %v2311_v38  ;;  %1789 = vmatpush3.bf16.msra.mxu1 %v2306_v27  ;;  %v1096_v36 = vld [vmem:[#allocation11 + $0xb8] sm:$0xff] }
 0x16b   :  { %1791 = vmatprep.subr.bf16.mxu1 %v2311_v38 }
 0x16d   :  { %1761 = vmatpush3.bf16.msra.mxu0 %v2311_v38 }
 0x16e   :  { %1763 = vmatprep.subr.bf16.mxu0 %v2317_v41  ;;  %1793 = vmatpush3.bf16.msra.mxu1 %v2311_v38 }
 0x16f   :  { %1795 = vmatprep.subr.bf16.mxu1 %v2317_v41 }
 0x171   :  { %1765 = vmatpush3.bf16.msra.mxu0 %v2317_v41 }
 0x172   :  { %1767 = vmatprep.subr.bf16.mxu0 %v2323_v44  ;;  %1797 = vmatpush3.bf16.msra.mxu1 %v2317_v41 }
 0x173   :  { %1799 = vmatprep.subr.bf16.mxu1 %v2323_v44 }
 0x175   :  { %1769 = vmatpush3.bf16.msra.mxu0 %v2323_v44 }
 0x176   :  { %1771 = vmatprep.subr.bf16.mxu0 %v2329_v47  ;;  %1801 = vmatpush3.bf16.msra.mxu1 %v2323_v44 }
 0x177   :  { %1803 = vmatprep.subr.bf16.mxu1 %v2329_v47 }
 0x179   :  { %1773 = vmatpush3.bf16.msra.mxu0 %v2329_v47 }
 0x17a   :  { %1805 = vmatpush3.bf16.msra.mxu1 %v2329_v47  ;;  %1775 = vmatprep.subr.bf16.mxu0 %v1774_v50 }
 0x17b   :  { %1807 = vmatprep.subr.bf16.mxu1 %v1774_v50 }
 0x17d   :  { %1777 = vmatpush3.bf16.msra.mxu0 %v1774_v50 }
 0x17e   :  { %1809 = vmatpush3.bf16.msra.mxu1 %v1774_v50  ;;  %1779 = vmatprep.subr.bf16.mxu0 %v1778_v53 }
 0x17f   :  { %1811 = vmatprep.subr.bf16.mxu1 %v1778_v53 }
 0x181   :  { %1781 = vmatpush3.bf16.msra.mxu0 %v1778_v53 }
 0x182   :  { %1813 = vmatpush3.bf16.msra.mxu1 %v1778_v53  ;;  %1815 = vmatprep.subr.bf16.mxu0 %v2299_v61 }
 0x183   :  { %1847 = vmatprep.subr.bf16.mxu1 %v1846_v21 }
 0x237   :  { %v471_v57 = vpop.f32.mrb[4].mxu0 }
 0x238   :  { %v548_v59 = vpop.f32.mrb[4].mxu1  ;;  %v473_v60 = vpop.f32.mrb[5].mxu0 }
 0x239   :  { %v566_v62 = vadd.f32 %v1313_v56, %v473_v60  ;;  %v550_v63 = vpop.f32.mrb[5].mxu1  ;;  %v584_v1 = vadd.f32 %v1315_v58, %v548_v59 }
 0x23a   :  { %v570_v2 = vadd.f32 %v550_v63, %v471_v57  ;;  %v1317_v57 = vld [vmem:[%s2412_s6] ss:$0 sm:$0xff] }
 0x23b   :  { %v568_v3 = vmax.f32 %v566_v62, 0.0  ;;  %v477_v4 = vpop.f32.mrb[6].mxu0  ;;  %v586_v10 = vmax.f32 %v584_v1, 0.0 }
 0x23c   :  { %v576_v5 = vadd.f32 %v1314_v0, %v570_v2  ;;  %v554_v6 = vpop.f32.mrb[6].mxu1  ;;  %v479_v7 = vpop.f32.mrb[7].mxu0 }
 0x23d   :  { %v567_v8 = vadd.f32 %v1313_v56, %v479_v7  ;;  %v556_v9 = vpop.f32.mrb[7].mxu1  ;;  %1457 = vmatprep.mubr.f32.mxu0 %v568_v3 }
 0x23e   :  { %v578_v11 = vmax.f32 %v576_v5, 0.0  ;;  %v571_v12 = vadd.f32 %v556_v9, %v477_v4  ;;  %v907_v9 = vld [vmem:[#allocation11 + $0x18] sm:$0xff] }
 0x23f   :  { %v569_v13 = vmax.f32 %v567_v8, 0.0  ;;  %v906_v8 = vld [vmem:[#allocation11 + $0x10] sm:$0xff] }
 0x240   :  { %v577_v14 = vadd.f32 %v1314_v0, %v571_v12  ;;  %1492 = vmatprep.mubr.f32.mxu1 %v578_v11 }
 0x241   :  { %1458 = vmatmul.mubr.f32.vlgmr.msra.gmra.mrb[8].mxu0 %v569_v13  ;;  %v1866_v13 = vpack.c.bf16 %v907_v9, %v906_v8 }
 0x242   :  { %v579_v15 = vmax.f32 %v577_v14, 0.0  ;;  %1817 = vmatpush3.bf16.msra.mxu0 %v2299_v61  ;;  %1527 = vmatprep.mubr.f32.mxu0 %v586_v10  ;;  %v585_v61 = vadd.f32 %v1315_v58, %v554_v6  ;;  %v908_v14 = vld [vmem:[#allocation11 + $0x20] sm:$0xff] }
 0x243   :  { %1819 = vmatprep.subr.bf16.mxu0 %v2306_v27 }
 0x244   :  { %1493 = vmatmul.mubr.f32.vlgmr.msra.gmra.mrb[8].mxu1 %v579_v15  ;;  %v587_v16 = vmax.f32 %v585_v61, 0.0  ;;  %v909_v15 = vld [vmem:[#allocation11 + $0x28] sm:$0xff] }
 0x245   :  { %1849 = vmatpush3.bf16.msra.mxu1 %v1846_v21 }
 0x246   :  { %1821 = vmatpush3.bf16.msra.mxu0 %v2306_v27  ;;  %1851 = vmatprep.subr.bf16.mxu1 %v1850_v23 }
 0x247   :  { %1823 = vmatprep.subr.bf16.mxu0 %v2311_v38 }
 0x249   :  { %1853 = vmatpush3.bf16.msra.mxu1 %v1850_v23  ;;  %v1090_v23 = vld [vmem:[#allocation11 + $0x88] sm:$0xff] }
 0x24a   :  { %1825 = vmatpush3.bf16.msra.mxu0 %v2311_v38  ;;  %1855 = vmatprep.subr.bf16.mxu1 %v1854_v34  ;;  %v904_v38 = vld [vmem:[#allocation11] sm:$0xff] }
 0x24b   :  { %1827 = vmatprep.subr.bf16.mxu0 %v2317_v41  ;;  %v1862_v40 = vpack.c.bf16 %v905_v39, %v904_v38  ;;  %v1890_v38 = vpack.c.bf16 %v1096_v36, %v1095_v35 }
 0x24d   :  { %1857 = vmatpush3.bf16.msra.mxu1 %v1854_v34  ;;  %v1886_v34 = vpack.c.bf16 %v1094_v33, %v1093_v32 }
 0x24e   :  { %1829 = vmatpush3.bf16.msra.mxu0 %v2317_v41  ;;  %1859 = vmatprep.subr.bf16.mxu1 %v1858_v37 }
 0x24f   :  { %1831 = vmatprep.subr.bf16.mxu0 %v2323_v44 }
 0x251   :  { %1861 = vmatpush3.bf16.msra.mxu1 %v1858_v37 }
 0x252   :  { %1833 = vmatpush3.bf16.msra.mxu0 %v2323_v44  ;;  %1863 = vmatprep.subr.bf16.mxu1 %v1862_v40 }
 0x253   :  { %1835 = vmatprep.subr.bf16.mxu0 %v2329_v47 }
 0x256   :  { %1837 = vmatpush3.bf16.msra.mxu0 %v2329_v47  ;;  %v1192_v47 = vld [vmem:[#allocation13 + $0x8] sm:$0xff] }
 0x257   :  { %1839 = vmatprep.subr.bf16.mxu0 %v1774_v50  ;;  %v1894_v49 = vpack.c.bf16 %v1192_v47, %v1191_v46 }
 0x25a   :  { %1841 = vmatpush3.bf16.msra.mxu0 %v1774_v50  ;;  %v1194_v50 = vld [vmem:[#allocation13 + $0x18] sm:$0xff] }
 0x25b   :  { %1843 = vmatprep.subr.bf16.mxu0 %v1778_v53  ;;  %v1898_v51 = vpack.c.bf16 %v1194_v50, %v1193_v48 }
 0x25e   :  { %1845 = vmatpush3.bf16.msra.mxu0 %v1778_v53  ;;  %v1196_v53 = vld [vmem:[#allocation13 + $0x28] sm:$0xff] }
 0x25f   :  { %1895 = vmatprep.subr.bf16.mxu0 %v1894_v49  ;;  %v1902_v54 = vpack.c.bf16 %v1196_v53, %v1195_v52 }
 0x261   :  { %1528 = vmatmul.mubr.f32.vlgmr.msra.gmra.mrb[10].mxu0 %v587_v16  ;;  %v1870_v16 = vpack.c.bf16 %v909_v15, %v908_v14 }
 0x262   :  { %1897 = vmatpush3.bf16.msra.mxu0 %v1894_v49 }
 0x263   :  { %1899 = vmatprep.subr.bf16.mxu0 %v1898_v51 }
 0x266   :  { %1901 = vmatpush3.bf16.msra.mxu0 %v1898_v51  ;;  %v1328_v51 = vld [vmem:[%s2416_s10] ss:$0 sm:$0xff] }
 0x267   :  { %1903 = vmatprep.subr.bf16.mxu0 %v1902_v54 }
 0x26a   :  { %1905 = vmatpush3.bf16.msra.mxu0 %v1902_v54 }
 0x314   :  { %v1459_v24 = vpop.f32.mrb[8].mxu0 }
 0x315   :  { %v670_v25 = vpop.f32.mrb[9].mxu0  ;;  %v843_v41 = vadd.f32 %v1459_v24, %v840_v20 }
 0x316   :  { %v842_v26 = vadd.f32 %v840_v20, %v670_v25  ;;  %v1874_v20 = vpack.c.bf16 %v911_v18, %v910_v17 }
 0x317   :  { %v1494_v27 = vpop.f32.mrb[8].mxu1  ;;  %v845_v44 = vmax.f32 %v843_v41, 0.0  ;;  %v1197_v41 = vld [vmem:[#allocation13 + $0x30] sm:$0xff] }
 0x318   :  { %v844_v29 = vmax.f32 %v842_v26, 0.0  ;;  %850 = vrot.lane.b32.xlu0 %v1494_v27, %s2130_s25  ;;  %v745_v30 = vpop.f32.mrb[9].mxu1  ;;  %v1091_v26 = vld [vmem:[#allocation11 + $0x90] sm:$0xff] }
 0x319   :  { %848 = vrot.lane.b32.xlu1 %v745_v30, %s2130_s25  ;;  %v895_v45 = vmax.f32 %v845_v44, %v892_v28 }
 0x31a   :  { %v894_v31 = vmax.f32 %v844_v29, %v892_v28  ;;  %v1320_v28 = vld [vmem:[%s2412_s6 + $0x4] ss:$0 sm:$0xff] }
 0x31c   :  { %1005 = vrot.lane.b32.xlu0 %v894_v31, %s2130_s25 }
 0x334   :  { %v2361_v42 = vpop.f32.mrb[10].mxu0 }
 0x335   :  { %v820_v43 = vpop.f32.mrb[11].mxu0  ;;  %v883_v37 = vadd.f32 %v2361_v42, %v1318_v19 }
 0x336   :  { %866 = vrot.lane.b32.xlu1 %v820_v43, %s2130_s25  ;;  %v882_v21 = vadd.f32 %v1318_v19, %v820_v43  ;;  %v1198_v43 = vld [vmem:[#allocation13 + $0x38] sm:$0xff] }
 0x337   :  { %v885_v39 = vmax.f32 %v883_v37, 0.0  ;;  %v1906_v44 = vpack.c.bf16 %v1198_v43, %v1197_v41 }
 0x339   :  { %1907 = vmatprep.subr.bf16.mxu0 %v1906_v44 }
 0x33a   :  { %868 = vrot.lane.b32.xlu1 %v2361_v42, %s2130_s25  ;;  %1909 = vmatpush3.bf16.msra.mxu0 %v1906_v44 }
 0x33e   :  { %1007 = vrot.lane.b32.xlu1 %v895_v45, %s2130_s25  ;;  %v1327_v45 = vld [vmem:[%s2414_s8] ss:$0 sm:$0xff]  ;;  %s2084_s8 = scalar_lea.vmem %s1295_s19, 256 }
 0x33f   :  { %p2085_p0 = scmp.ne.s32.totalorder %s1295_s19, %s2084_s8  ;;  %p2090_p2 = scmp.lt.s32.totalorder %s2084_s8, %s2084_s8 }
 0x341   :  { %p2091_p3 = por %p2090_p2, %p2089_p1 }
 0x343   :  { %p2092_p4 = pnand %p2091_p3, %p2085_p0 }
 0x38a   :  { %v851_v58 = vpop.permute.xlu0 %850 }
 0x38b   :  { %v849_v55 = vpop.permute.xlu1 %848  ;;  %v855_v60 = vadd.f32 %v1459_v24, %v851_v58  ;;  %v1878_v24 = vpack.c.bf16 %v1090_v23, %v1089_v22 }
 0x38c   :  { %v854_v56 = vadd.f32 %v849_v55, %v670_v25  ;;  %v884_v25 = vmax.f32 %v882_v21, 0.0 }
 0x38d   :  { %v861_v2 = vadd.f32 %v1317_v57, %v855_v60 }
 0x38e   :  { %v860_v62 = vadd.f32 %v1317_v57, %v854_v56  ;;  %v1006_v61 = vpop.permute.xlu0 %1005 }
 0x38f   :  { %v863_v10 = vmax.f32 %v861_v2, 0.0 }
 0x390   :  { %v862_v3 = vmax.f32 %v860_v62, 0.0 }
 0x3a8   :  { %v867_v59 = vpop.permute.xlu1 %866 }
 0x3a9   :  { %v872_v63 = vadd.f32 %v867_v59, %v745_v30  ;;  %v902_v30 = vmax.f32 %v884_v25, %v1320_v28 }
 0x3ab   :  { %v874_v0 = vadd.f32 %v1317_v57, %v872_v63 }
 0x3ac   :  { %v869_v1 = vpop.permute.xlu1 %868 }
 0x3ad   :  { %v876_v4 = vmax.f32 %v874_v0, 0.0  ;;  %v873_v5 = vadd.f32 %v1494_v27, %v869_v1  ;;  %v1092_v27 = vld [vmem:[#allocation11 + $0x98] sm:$0xff] }
 0x3ae   :  { %v1882_v29 = vpack.c.bf16 %v1092_v27, %v1091_v26 }
 0x3af   :  { %v896_v6 = vmax.f32 %v862_v3, %v876_v4  ;;  %v875_v7 = vadd.f32 %v1317_v57, %v873_v5 }
 0x3b0   :  { %v1008_v31 = vpop.permute.xlu1 %1007 }
 0x3b1   :  { %v877_v11 = vmax.f32 %v875_v7, 0.0  ;;  %1546 = vmatprep.mubr.msk.f32.mxu1 %vm921_vm1, %v896_v6 }
 0x3b3   :  { %v897_v12 = vmax.f32 %v863_v10, %v877_v11 }
 0x3b5   :  { %1547 = vmatmul.mubr.msk.f32.vlgmr.msra.gmra.mrb[10].mxu1 %vm921_vm1, %v897_v12 }
 0x3b6   :  { %1865 = vmatpush3.bf16.msra.mxu1 %v1862_v40  ;;  %1565 = vmatprep.mubr.msk.f32.mxu1 %vm921_vm1, %v1006_v61  ;;  %v903_v40 = vmax.f32 %v885_v39, %v1320_v28 }
 0x3b7   :  { %1867 = vmatprep.subr.bf16.mxu1 %v1866_v13 }
 0x3ba   :  { %1869 = vmatpush3.bf16.msra.mxu1 %v1866_v13 }
 0x3bb   :  { %1871 = vmatprep.subr.bf16.mxu1 %v1870_v16 }
 0x3be   :  { %1873 = vmatpush3.bf16.msra.mxu1 %v1870_v16 }
 0x3bf   :  { %1875 = vmatprep.subr.bf16.mxu1 %v1874_v20 }
 0x3c2   :  { %1877 = vmatpush3.bf16.msra.mxu1 %v1874_v20 }
 0x3c3   :  { %1879 = vmatprep.subr.bf16.mxu1 %v1878_v24 }
 0x3c5   :  { %1566 = vmatmul.mubr.msk.f32.vlgmr.msra.gmra.mrb[10].mxu1 %vm921_vm1, %v1008_v31 }
 0x3c6   :  { %1881 = vmatpush3.bf16.msra.mxu1 %v1878_v24  ;;  %1584 = vmatprep.mubr.msk.f32.mxu1 %vm921_vm1, %v902_v30 }
 0x3c7   :  { %1883 = vmatprep.subr.bf16.mxu1 %v1882_v29 }
 0x3ca   :  { %1885 = vmatpush3.bf16.msra.mxu1 %v1882_v29 }
 0x3cb   :  { %1887 = vmatprep.subr.bf16.mxu1 %v1886_v34 }
 0x3ce   :  { %1889 = vmatpush3.bf16.msra.mxu1 %v1886_v34 }
 0x3cf   :  { %1891 = vmatprep.subr.bf16.mxu1 %v1890_v38 }
 0x3d2   :  { %1893 = vmatpush3.bf16.msra.mxu1 %v1890_v38 }
 0x3d5   :  { %1585 = vmatmul.mubr.msk.f32.vlgmr.msra.gmra.mrb[10].mxu1 %vm921_vm1, %v903_v40 }
 0x4a8   :  { %v1586_v46 = vpop.f32.mrb[10].mxu1 }
 0x4a9   :  { %v1188_v42 = vadd.f32 %v1586_v46, %v1327_v45  ;;  %v1169_v47 = vpop.f32.mrb[11].mxu1 }
 0x4aa   :  { %v1187_v48 = vadd.f32 %v1327_v45, %v1169_v47 }
 0x4ab   :  { %v1190_v50 = vmax.f32 %v1188_v42, 0.0 }
 0x4ac   :  { %v1189_v49 = vmax.f32 %v1187_v48, 0.0 }
 0x4ae   :  { %1603 = vmatprep.mubr.msk.f32.mxu0 %vm921_vm1, %v1189_v49 }
 0x4af   :  { %1604 = vmatmul.mubr.msk.f32.vlgmr.msra.gmra.mrb[12].mxu0 %vm921_vm1, %v1190_v50 }
 0x582   :  { %v1605_v52 = vpop.f32.mrb[12].mxu0 }
 0x583   :  { %v1284_v53 = vadd.f32 %v1605_v52, %v1328_v51  ;;  %v1278_v54 = vpop.f32.mrb[13].mxu0 }
 0x584   :  { %v1279_v55 = vadd.f32 %v1328_v51, %v1278_v54 }
 0x585   :  { %1288 = vst [vmem:[#allocation14 + $0x8] sm:$0xff] %v1284_v53 }
 0x586   :  { %1287 = vst [vmem:[#allocation14] sm:$0xff] %v1279_v55 }
 0x587   :  { %2095 = shalt.err (!%p2092_p4)
}
 0x588   :  { %s2096_s10 = scalar_lea.hbm %s2417_s11, 256 }
 0x589   :  { %p2097_p5 = scmp.ne.s32.totalorder %s2417_s11, %s2096_s10  ;;  %p2100_p6 = scmp.lt.u32.totalorder %s2096_s10, %s2417_s11 }
 0x58b   :  { %p2102_p7 = pnand %p2100_p6, %p2097_p5 }
 0x58d   :  { %2105 = shalt.err (!%p2102_p7)
}
 0x58e   :  { %1300 = dma.vmem_to_hbm [thread:$0]  %s1295_s19, 256, %s2417_s11, [#allocation4], %s2122_s13, %s2122_s13, %s2123_s16  }
 0x58f   :  { %2114 = dma.done.wait [#allocation4], 256  }
 0x590   :  { %2115 = vsyncadd [#allocation4], 4294967040 }
 0x591   :  { %1304 = vsyncpa [#allocation3], 1 }
 0x592   :  { %1305 = vsyncpa [#allocation6], 1 }
 0x593   :  { %1306 = vsyncpa [#allocation9], 1 }
 0x594   :  { %1307 = vsyncpa [#allocation12], 1 }
 0x595   :  { %1308 = vsyncpa [#allocation4], 1 }

</bundles_post_ra>
